<compile_context>
chip_gen: v6e
topology: v6e:2x2x1
jax: 0.10.0
libtpu: 0.0.40
codegen_flags: <defaults>
</compile_context>

<pallas_src>
import functools

import jax
import jax.numpy as jnp
from jax import lax
from jax.experimental import pallas as pl
from jax.experimental.pallas import tpu as pltpu


def _conv3x3_kernel(w_ref, x_ref, o_ref, *, width):
    """One (batch, row-tile) step of the 3x3 same-pad conv.

    w_ref: (E, 9*C)        resident weight matrix, k = (kh*3 + kw)*C + c
    x_ref: (C, (TH+4)*W)   flattened row window: input rows [t*TH-2, t*TH+TH+2)
                           (out-of-range rows already zero-filled), W unpadded
    o_ref: (E, TH*W)       flattened NCHW output rows [t*TH, t*TH+TH)
    """
    W = width
    M = o_ref.shape[-1]                                   # TH * W
    # Column-in-row index of every output lane, for left/right border masking.
    col = lax.broadcasted_iota(jnp.int32, (1, M), 1) % W
    not_left = col != 0
    not_right = col != (W - 1)

    parts = []
    for kh in range(3):
        for kw in range(3):
            d = (kh + 1) * W + (kw - 1)                   # constant lane shift, >= W-1
            sl = x_ref[:, d:d + M]                        # (C, M) static slice
            if kw == 0:                                   # reads column w-1: zero at w==0
                sl = jnp.where(not_left, sl, 0)
            elif kw == 2:                                 # reads column w+1: zero at w==W-1
                sl = jnp.where(not_right, sl, 0)
            parts.append(sl)
    col_mat = jnp.concatenate(parts, axis=0)              # (9C, M) im2col

    acc = jnp.dot(w_ref[...], col_mat,
                  preferred_element_type=jnp.float32)     # single K=9C MXU matmul, f32 acc
    o_ref[...] = acc.astype(o_ref.dtype)


def _pick_tile_rows(H, W, C, E, budget_bytes=12 << 20):
    """Largest row tile whose per-step working set fits a conservative VMEM budget
    (sized for v7x's 64 MiB; v5e/v6e have more headroom)."""
    per_row = 4 * W * (9 * C + 2 * C + 3 * E)             # im2col + dbl-buf input + acc/out
    max_rows = max(1, budget_bytes // max(per_row, 1))
    if H <= max_rows:
        return H                                          # whole image per grid step
    for th in range(min(H - 1, max_rows), 0, -1):
        # keep both the input window and the output block lane-dense (mult. of 128)
        if H % th == 0 and (th * W) % 128 == 0 and ((th + 4) * W) % 128 == 0:
            return th
    return H                                              # fallback: no valid tiling found


def conv3x3_same(x, w):
    """Conv2d(C -> E, 3x3, stride=1, pad=1, bias=False) on NCHW input via Pallas."""
    N, C, H, W = x.shape
    E = w.shape[0]
    assert w.shape == (E, C, 3, 3)

    TH = _pick_tile_rows(H, W, C, E)
    n_tiles = H // TH
    R = TH + 4                       # rows per halo'd window (2 slack rows each side)
    L = R * W                        # flattened window length per tile
    M = TH * W                       # flattened output length per tile

    # Halo'd, zero-filled row windows, flattened lane-dense:
    #   x_win[b, c, t*L + r*W + w] = x[b, c, t*TH - 2 + r, w]   (0 outside [0, H)).
    # One gather pass over the input; no NCHW<->NHWC transposes, no jnp.pad pass.
    row_idx = (jnp.arange(n_tiles) * TH - 2)[:, None] + jnp.arange(R)[None, :]
    row_idx = jnp.where((row_idx < 0) | (row_idx >= H), H, row_idx)    # OOB sentinel
    x_win = jnp.take(x, row_idx, axis=2, mode="fill", fill_value=0)    # (N,C,n_tiles,R,W)
    x_win = x_win.reshape(N, C, n_tiles * L)

    # Weight as an (E, 9C) matrix with k = (kh*3 + kw)*C + c (matches the kernel's
    # im2col ordering); tiny, constant index_map keeps it resident across the grid.
    w_mat = jnp.transpose(w, (0, 2, 3, 1)).reshape(E, 9 * C)

    kernel = functools.partial(_conv3x3_kernel, width=W)

    out_flat = pl.pallas_call(
        kernel,
        out_shape=jax.ShapeDtypeStruct((N, E, H * W), x.dtype),
        grid_spec=pltpu.PrefetchScalarGridSpec(
            num_scalar_prefetch=0,
            grid=(N, n_tiles),
            in_specs=[
                pl.BlockSpec((E, 9 * C), lambda b, t: (0, 0)),         # resident weight
                pl.BlockSpec((None, C, L), lambda b, t: (b, 0, t)),    # halo'd row window
            ],
            out_specs=pl.BlockSpec((None, E, M), lambda b, t: (b, 0, t)),
        ),
        compiler_params=pltpu.CompilerParams(
            dimension_semantics=("parallel", "parallel"),
            vmem_limit_bytes=48 * 1024 * 1024,
        ),
    )(w_mat, x_win)

    return out_flat.reshape(N, E, H, W)


def downsample(x, w):
    """PromptIR Downsample.forward: conv3x3(n_feat -> n_feat//2) + PixelUnshuffle(2)."""
    N, C, H, W = x.shape
    E = w.shape[0]
    assert H % 2 == 0 and W % 2 == 0
    y = conv3x3_same(x, w)                                 # (N, E, H, W)
    # PixelUnshuffle(2): out[:, e*4 + 2*i + j, h, w] = y[:, e, 2*h + i, 2*w + j].
    y = y.reshape(N, E, H // 2, 2, W // 2, 2)
    y = jnp.transpose(y, (0, 1, 3, 5, 2, 4))
    return y.reshape(N, 4 * E, H // 2, W // 2)


if __name__ == "__main__":
    key = jax.random.PRNGKey(0)
    k_x, k_w = jax.random.split(key)

    # Small shapes consistent with Downsample(n_feat=16): x (N, n_feat, H, W),
    # conv weight (n_feat//2, n_feat, 3, 3); output (N, 2*n_feat, H/2, W/2).
    N, n_feat, H, W = 2, 16, 16, 16
    E = n_feat // 2

    x = jax.random.normal(k_x, (N, n_feat, H, W), dtype=jnp.float32)
    w = jax.random.normal(k_w, (E, n_feat, 3, 3), dtype=jnp.float32) * 0.1

    out = jax.block_until_ready(downsample(x, w))
    assert out.shape == (N, 2 * n_feat, H // 2, W // 2), out.shape

    # Reference: XLA conv (NCHW/OIHW, stride 1, pad 1) + explicit pixel-unshuffle.
    y_ref = lax.conv_general_dilated(
        x, w, window_strides=(1, 1), padding=((1, 1), (1, 1)),
        dimension_numbers=("NCHW", "OIHW", "NCHW"))
    z_ref = jnp.stack(
        [y_ref[:, :, 0::2, 0::2], y_ref[:, :, 0::2, 1::2],
         y_ref[:, :, 1::2, 0::2], y_ref[:, :, 1::2, 1::2]], axis=2)
    z_ref = z_ref.reshape(N, 4 * E, H // 2, W // 2)

    # Tolerance covers MXU default-precision rounding differences between the two paths.
    err = float(jnp.max(jnp.abs(out - z_ref)))
    scale = float(jnp.max(jnp.abs(z_ref))) + 1e-6
    assert err <= 2e-2 * scale, f"mismatch vs reference: max_err={err}, scale={scale}"

    print("KERNEL_OK")
</pallas_src>

<mosaic_0001>
module attributes {stable_mosaic.version = 11 : i64} {
  func.func @_conv3x3_kernel(%arg0: i32, %arg1: i32, %arg2: memref<8x144xf32, #tpu.memory_space<vmem>>, %arg3: memref<1x16x320xf32, #tpu.memory_space<vmem>>, %arg4: memref<1x8x256xf32, #tpu.memory_space<vmem>>) attributes {dimension_semantics = [#tpu.dimension_semantics<parallel>, #tpu.dimension_semantics<parallel>], iteration_bounds = array<i64: 2, 1>, scalar_prefetch = 0 : i64, scratch_operands = 0 : i64, tpu.core_type = #tpu.core_type<tc>, window_params = [{pipeline_mode = #tpu.pipeline_mode<synchronous>, transform_indices = @transform_0, window_bounds = array<i64: 8, 144>}, {transform_indices = @transform_1, window_bounds = array<i64: 1, 16, 320>}, {transform_indices = @transform_2, window_bounds = array<i64: 1, 8, 256>}]} {
    %0 = tpu.iota {dimensions = array<i32: 1>} : vector<1x256xi32>
    %c16_i32 = arith.constant 16 : i32
    %c0_i32 = arith.constant 0 : i32
    %1 = arith.cmpi eq, %c16_i32, %c0_i32 : i32
    %c1_i32 = arith.constant 1 : i32
    %2 = arith.select %1, %c1_i32, %c16_i32 : i32
    %3 = vector.broadcast %2 : i32 to vector<1x256xi32>
    %4 = arith.remsi %0, %3 : vector<1x256xi32>
    %c0_i32_0 = arith.constant 0 : i32
    %5 = vector.broadcast %c0_i32_0 : i32 to vector<1x256xi32>
    %6 = arith.cmpi ne, %4, %5 : vector<1x256xi32>
    %c0_i32_1 = arith.constant 0 : i32
    %7 = vector.broadcast %c0_i32_1 : i32 to vector<1x256xi32>
    %8 = arith.cmpi slt, %4, %7 : vector<1x256xi32>
    %c0_i32_2 = arith.constant 0 : i32
    %9 = arith.cmpi slt, %2, %c0_i32_2 : i32
    %10 = vector.broadcast %9 : i1 to vector<1x256xi1>
    %11 = vector.broadcast %10 : vector<1x256xi1> to vector<1x256xi1>
    %12 = arith.xori %8, %11 : vector<1x256xi1>
    %13 = arith.andi %12, %6 : vector<1x256xi1>
    %14 = vector.broadcast %2 : i32 to vector<1x256xi32>
    %15 = arith.addi %4, %14 : vector<1x256xi32>
    %16 = arith.select %13, %15, %4 : vector<1x256xi1>, vector<1x256xi32>
    %c0_i32_3 = arith.constant 0 : i32
    %17 = vector.broadcast %c0_i32_3 : i32 to vector<1x256xi32>
    %18 = arith.cmpi ne, %16, %17 : vector<1x256xi32>
    %c15_i32 = arith.constant 15 : i32
    %19 = vector.broadcast %c15_i32 : i32 to vector<1x256xi32>
    %20 = arith.cmpi ne, %16, %19 : vector<1x256xi32>
    %c0 = arith.constant 0 : index
    %c0_4 = arith.constant 0 : index
    %c15 = arith.constant 15 : index
    %21 = vector.load %arg3[%c0, %c0_4, %c15] : memref<1x16x320xf32, #tpu.memory_space<vmem>>, vector<1x16x256xf32>
    %22 = vector.shape_cast %21 : vector<1x16x256xf32> to vector<16x256xf32>
    %c0_i32_5 = arith.constant 0 : i32
    %23 = arith.sitofp %c0_i32_5 : i32 to f32
    %24 = vector.shape_cast %18 : vector<1x256xi1> to vector<1x256xi1>
    %25 = vector.broadcast %24 : vector<1x256xi1> to vector<16x256xi1>
    %26 = vector.broadcast %23 : f32 to vector<16x256xf32>
    %27 = arith.select %25, %22, %26 : vector<16x256xi1>, vector<16x256xf32>
    %c0_6 = arith.constant 0 : index
    %c0_7 = arith.constant 0 : index
    %c16 = arith.constant 16 : index
    %28 = vector.load %arg3[%c0_6, %c0_7, %c16] : memref<1x16x320xf32, #tpu.memory_space<vmem>>, vector<1x16x256xf32>
    %29 = vector.shape_cast %28 : vector<1x16x256xf32> to vector<16x256xf32>
    %c0_8 = arith.constant 0 : index
    %c0_9 = arith.constant 0 : index
    %c17 = arith.constant 17 : index
    %30 = vector.load %arg3[%c0_8, %c0_9, %c17] : memref<1x16x320xf32, #tpu.memory_space<vmem>>, vector<1x16x256xf32>
    %31 = vector.shape_cast %30 : vector<1x16x256xf32> to vector<16x256xf32>
    %c0_i32_10 = arith.constant 0 : i32
    %32 = arith.sitofp %c0_i32_10 : i32 to f32
    %33 = vector.shape_cast %20 : vector<1x256xi1> to vector<1x256xi1>
    %34 = vector.broadcast %33 : vector<1x256xi1> to vector<16x256xi1>
    %35 = vector.broadcast %32 : f32 to vector<16x256xf32>
    %36 = arith.select %34, %31, %35 : vector<16x256xi1>, vector<16x256xf32>
    %c0_11 = arith.constant 0 : index
    %c0_12 = arith.constant 0 : index
    %c31 = arith.constant 31 : index
    %37 = vector.load %arg3[%c0_11, %c0_12, %c31] : memref<1x16x320xf32, #tpu.memory_space<vmem>>, vector<1x16x256xf32>
    %38 = vector.shape_cast %37 : vector<1x16x256xf32> to vector<16x256xf32>
    %c0_i32_13 = arith.constant 0 : i32
    %39 = arith.sitofp %c0_i32_13 : i32 to f32
    %40 = vector.shape_cast %18 : vector<1x256xi1> to vector<1x256xi1>
    %41 = vector.broadcast %40 : vector<1x256xi1> to vector<16x256xi1>
    %42 = vector.broadcast %39 : f32 to vector<16x256xf32>
    %43 = arith.select %41, %38, %42 : vector<16x256xi1>, vector<16x256xf32>
    %c0_14 = arith.constant 0 : index
    %c0_15 = arith.constant 0 : index
    %c32 = arith.constant 32 : index
    %44 = vector.load %arg3[%c0_14, %c0_15, %c32] : memref<1x16x320xf32, #tpu.memory_space<vmem>>, vector<1x16x256xf32>
    %45 = vector.shape_cast %44 : vector<1x16x256xf32> to vector<16x256xf32>
    %c0_16 = arith.constant 0 : index
    %c0_17 = arith.constant 0 : index
    %c33 = arith.constant 33 : index
    %46 = vector.load %arg3[%c0_16, %c0_17, %c33] : memref<1x16x320xf32, #tpu.memory_space<vmem>>, vector<1x16x256xf32>
    %47 = vector.shape_cast %46 : vector<1x16x256xf32> to vector<16x256xf32>
    %c0_i32_18 = arith.constant 0 : i32
    %48 = arith.sitofp %c0_i32_18 : i32 to f32
    %49 = vector.shape_cast %20 : vector<1x256xi1> to vector<1x256xi1>
    %50 = vector.broadcast %49 : vector<1x256xi1> to vector<16x256xi1>
    %51 = vector.broadcast %48 : f32 to vector<16x256xf32>
    %52 = arith.select %50, %47, %51 : vector<16x256xi1>, vector<16x256xf32>
    %c0_19 = arith.constant 0 : index
    %c0_20 = arith.constant 0 : index
    %c47 = arith.constant 47 : index
    %53 = vector.load %arg3[%c0_19, %c0_20, %c47] : memref<1x16x320xf32, #tpu.memory_space<vmem>>, vector<1x16x256xf32>
    %54 = vector.shape_cast %53 : vector<1x16x256xf32> to vector<16x256xf32>
    %c0_i32_21 = arith.constant 0 : i32
    %55 = arith.sitofp %c0_i32_21 : i32 to f32
    %56 = vector.shape_cast %18 : vector<1x256xi1> to vector<1x256xi1>
    %57 = vector.broadcast %56 : vector<1x256xi1> to vector<16x256xi1>
    %58 = vector.broadcast %55 : f32 to vector<16x256xf32>
    %59 = arith.select %57, %54, %58 : vector<16x256xi1>, vector<16x256xf32>
    %c0_22 = arith.constant 0 : index
    %c0_23 = arith.constant 0 : index
    %c48 = arith.constant 48 : index
    %60 = vector.load %arg3[%c0_22, %c0_23, %c48] : memref<1x16x320xf32, #tpu.memory_space<vmem>>, vector<1x16x256xf32>
    %61 = vector.shape_cast %60 : vector<1x16x256xf32> to vector<16x256xf32>
    %c0_24 = arith.constant 0 : index
    %c0_25 = arith.constant 0 : index
    %c49 = arith.constant 49 : index
    %62 = vector.load %arg3[%c0_24, %c0_25, %c49] : memref<1x16x320xf32, #tpu.memory_space<vmem>>, vector<1x16x256xf32>
    %63 = vector.shape_cast %62 : vector<1x16x256xf32> to vector<16x256xf32>
    %c0_i32_26 = arith.constant 0 : i32
    %64 = arith.sitofp %c0_i32_26 : i32 to f32
    %65 = vector.shape_cast %20 : vector<1x256xi1> to vector<1x256xi1>
    %66 = vector.broadcast %65 : vector<1x256xi1> to vector<16x256xi1>
    %67 = vector.broadcast %64 : f32 to vector<16x256xf32>
    %68 = arith.select %66, %63, %67 : vector<16x256xi1>, vector<16x256xf32>
    %69 = tpu.concatenate %27, %29, %36, %43, %45, %52, %59, %61, %68 in 0 : vector<16x256xf32>, vector<16x256xf32>, vector<16x256xf32>, vector<16x256xf32>, vector<16x256xf32>, vector<16x256xf32>, vector<16x256xf32>, vector<16x256xf32>, vector<16x256xf32> -> vector<144x256xf32>
    %c0_27 = arith.constant 0 : index
    %c0_28 = arith.constant 0 : index
    %70 = vector.load %arg2[%c0_27, %c0_28] : memref<8x144xf32, #tpu.memory_space<vmem>>, vector<8x144xf32>
    %cst = arith.constant dense<0.000000e+00> : vector<8x256xf32>
    %71 = tpu.matmul %70, %69, %cst {dimension_numbers = #tpu.dot_dimension_numbers<[1], [0], [0], [1], [0, 0, 1, 1], [], []>} : vector<8x144xf32>, vector<144x256xf32>, vector<8x256xf32> -> vector<8x256xf32>
    %c0_29 = arith.constant 0 : index
    %c0_30 = arith.constant 0 : index
    %c0_31 = arith.constant 0 : index
    %72 = vector.load %arg4[%c0_29, %c0_30, %c0_31] : memref<1x8x256xf32, #tpu.memory_space<vmem>>, vector<1x8x256xf32>
    %73 = vector.shape_cast %72 : vector<1x8x256xf32> to vector<8x256xf32>
    %74 = vector.shape_cast %71 : vector<8x256xf32> to vector<1x8x256xf32>
    tpu.vector_store %arg4[%c0_29, %c0_30, %c0_31], %74 {strides = array<i32>} : memref<1x8x256xf32, #tpu.memory_space<vmem>>, vector<1x8x256xf32>,
    return
  }
  func.func @transform_0(%arg0: i32, %arg1: i32) -> (i32, i32) {
    %c0_i32 = arith.constant 0 : i32
    %c0_i32_0 = arith.constant 0 : i32
    %c0_i32_1 = arith.constant 0 : i32
    return %c0_i32, %c0_i32_0 : i32, i32
  }
  func.func @transform_1(%arg0: i32, %arg1: i32) -> (i32, i32, i32) {
    %c0_i32 = arith.constant 0 : i32
    %c0_i32_0 = arith.constant 0 : i32
    return %arg0, %c0_i32, %arg1 : i32, i32, i32
  }
  func.func @transform_2(%arg0: i32, %arg1: i32) -> (i32, i32, i32) {
    %c0_i32 = arith.constant 0 : i32
    %c0_i32_0 = arith.constant 0 : i32
    return %arg0, %c0_i32, %arg1 : i32, i32, i32
  }
}

</mosaic_0001>

<bundles_post_ra>
// kernel: tpu_custom_call.1
= control target key start
LH: loop header
LB: loop body
LE: loop exit
PB: predicated region body
PF: predicated region fallthrough
CT: control target
= control target key end

     0   :  { %7 = vsyncpa [#allocation3], 0  ;;  %s1207_s0 = inlined_call_operand.hbm [shape: f32[8,144], index: 0, kind: input, shape index: {}]   ;;  %s1208_s1 = inlined_call_operand.hbm [shape: f32[2,16,320], index: 1, kind: input, shape index: {}]   ;;  %s1209_s2 = inlined_call_operand.hbm [shape: f32[2,8,256], index: 2, kind: output, shape index: {}]  }
   0x1   :  { %8 = vsyncpa [#allocation6], 0 }
   0x2   :  { %10 = vsyncpa [#allocation6 + $0x1], 0 }
   0x3   :  { %11 = vsyncpa [#allocation4], 0 }
   0x4   :  { %13 = vsyncpa [#allocation4 + $0x1], 0  ;;  %s947_s9 = smov 0   ;;  %s949_s10 = smov 0  }
   0x5   :  { %s951_s11 = smov 0   ;;  %s953_s12 = smov 0  }
   0x6   :  { %s955_s13 = smov 0   ;;  %s957_s14 = smov 0  }
   0x7 LB: > { %s651_s15 = sadd.s32 4294967295, %s916_s14   ;;  %s652_s16 = sadd.s32 4294967294, %s916_s14   ;;  %s916_s14 = sphi %s957_s14, %s19_s14   ;;  %s912_s13 = sphi %s955_s13, %s1236_s13   ;;  %s908_s12 = sphi %s953_s12, %s1235_s12   ;;  %s904_s11 = sphi %s951_s11, %s1234_s11   ;;  %s900_s10 = sphi %s949_s10, %s1233_s10   ;;  %s896_s9 = sphi %s947_s9, %s1232_s9  }
   0x8   : > { %s61_s17 = sadd.s32 1, %s904_s11  ;;  %p68_p0 = scmp.ne.s32.totalorder %s904_s11, %s900_s10 }
   0x9   : > { %p69_p1 = scmp.eq.s32.totalorder %s916_s14, 0  ;;  %p74_p2 = scmp.ne.s32.totalorder %s900_s10, %s896_s9 }
   0xa   : > { %p985_p3 = scmp.eq.s32.totalorder %s651_s15, 0  ;;  %p100_p4 = scmp.eq.s32.totalorder %s651_s15, 1 }
   0xb   : > { %p989_p5 = por %p69_p1, %p68_p0  ;;  %p106_p6 = scmp.eq.s32.totalorder %s652_s16, 1 }
   0xc   : > { %p995_p7 = por %p985_p3, %p74_p2  ;;  %p999_p8 = por %p100_p4, %p68_p0 }
   0xd   : > { %p1003_p9 = por %p106_p6, %p74_p2  ;;  %p653_p10 = scmp.ge.s32.totalorder %s916_s14, 1 }
   0xe   : > { %s1214_s20 = scalar_select %p995_p7, 1, 0 }
   0xf   : > { %s1215_s21 = scalar_select %p999_p8, 1, 0 }
  0x10   : > { %s1216_s22 = scalar_select %p1003_p9, 1, 0 }
  0x11   : > { %p113_p11 = scmp.lt.s32.totalorder %s916_s14, 3  ;;  %s918_s24 = smov [#allocation2]  }
  0x12   : > { %s126_s25 = sshll.u32 %s918_s24, 4  ;;  %p715_p1 = scmp.lt.s32.totalorder %s916_s14, 2  ;;  %s127_s25 = int_to_ptr.vmem [resolvable:$true] %s126_s25 }
  0x13   : > { %p1010_p13 = pnand %p653_p10, %p113_p11  ;;  %s31_s28 = sadd.s32 1, %s912_s13 }
  0x14   : > { %p1019_p4 = pnand %p715_p1, %p989_p5  ;;  %p33_p6 = scmp.ge.s32.totalorder %s31_s28, 2 }
  0x15   : > { %p702_p0 = pneg %p1010_p13  ;;  %s137_s29 = sand.u32 1, %s904_s11  }
  0x16   : > { %s789_s30 = scalar_lea.vmem %s127_s25, 256  ;;  %p797_p8 = scmp.lt.s32.totalorder %s127_s25, %s127_s25 }
  0x17   : > { %p1025_p2 = pnand %p702_p0, %p985_p3  ;;  %p790_p11 = scmp.ne.s32.totalorder %s127_s25, %s789_s30 }
  0x18   : > { %p798_p5 = scmp.lt.s32.totalorder %s789_s30, %s789_s30 }
  0x19   : > { %p780_p10 = pneg %p1025_p2 }
  0x1a   : > { %p799_p1 = por %p798_p5, %p797_p8 }
  0x1b   : > { %p792_p12 = pnand %p790_p11, %p780_p10 }
  0x1d   : > { %p793_p9 = pneg %p792_p12 }
  0x1f   : > { %p800_p7 = pnand %p799_p1, %p793_p9 }
  0x21   : > { %803 = shalt.err (!%p800_p7)
}
  0x22   : > { %705 = dma.hbm_to_vmem [thread:$0]  (!%p1025_p2), %s1207_s0, 256, %s127_s25, [#allocation3]  }
  0x23   : > { %s1238_s28 = smov (%p33_p6, %s31_s28), 0  ;;  %s691_s5 = smul.u32 48, %s137_s29 }
  0x24   : > { %s56_s6 = ssub.s32 %s912_s13, %s1238_s28  ;;  %s692_s7 = smul.u32 768, %s912_s13 }
  0x25   : > { %p59_p8 = scmp.eq.s32.totalorder %s56_s6, 0  ;;  %s141_s19 = scalar_lea.vmem [#allocation5], %s691_s5 }
  0x26   : > { %s149_s16 = scalar_lea.hbm %s1208_s1, %s692_s7  ;;  %s150_s24 = sshll.u32 %s141_s19, 4  ;;  %s151_s24 = int_to_ptr.vmem [resolvable:$true] %s150_s24 }
  0x27   : > { %s1049_s27 = scalar_select %p59_p8, %s904_s11, %s61_s17  }
  0x28   : > { %s138_s30 = scalar_lea.sflag [#allocation6], %s137_s29  ;;  %p806_p7 = pneg %p1019_p4 }
  0x29   : > { %s817_s25 = scalar_lea.vmem %s151_s24, 768  ;;  %s919_s3 = smov [#allocation5]  }
  0x2a   : > { %p818_p9 = scmp.ne.s32.totalorder %s151_s24, %s817_s25  ;;  %s822_s4 = sshll.u32 %s919_s3, 4  ;;  %s823_s4 = int_to_ptr.vmem [resolvable:$false] %s822_s4 }
  0x2b   : > { %s824_s6 = scalar_lea.vmem %s823_s4, 1536  ;;  %p825_p2 = scmp.lt.s32.totalorder %s151_s24, %s823_s4 }
  0x2c   : > { %p820_p12 = pnand %p818_p9, %p806_p7  ;;  %p826_p6 = scmp.lt.s32.totalorder %s824_s6, %s817_s25 }
  0x2e   : > { %p821_p0 = pneg %p820_p12  ;;  %p827_p10 = por %p826_p6, %p825_p2 }
  0x30   : > { %p828_p11 = pnand %p827_p10, %p821_p0 }
  0x32   : > { %831 = shalt.err (!%p828_p11)
}
  0x33   : > { %s920_s5 = smov 384   ;;  %s921_s17 = smov 24  }
  0x34   : > { %709 = dma.hbm_to_vmem [thread:$0]  (!%p1019_p4), %s149_s16, 768, %s151_s24, %s138_s30, %s920_s5, %s920_s5, %s921_s17  }
  0x35   : > { %162 = sbr.rel (%p1010_p13) target bundleno = 495 (0x1ef), region = 28 }
  0x3a   : > { %883 = dma.done.wait (%p985_p3), [#allocation3], 256  }
  0x3b   : > { %885 = vsyncadd (%p985_p3), [#allocation3], 4294967040  ;;  %s1062_s29 = sand.u32 1, %s900_s10   ;;  %p1220_p5 = scmp.ne.s32.totalorder %s1214_s20, 0 }
  0x3c   : > { %s693_s7 = smul.u32 48, %s1062_s29  ;;  %s169_s8 = scalar_lea.sflag [#allocation6], %s1062_s29 }
  0x3e   : > { %s172_s15 = scalar_lea.vmem [#allocation5], %s693_s7 }
  0x3f   : > { %887 = dma.done.wait (%p1220_p5), %s169_s8, 768  }
  0x40   : > { %889 = vsyncadd (%p1220_p5), %s169_s8, 4294966528  ;;  %v1070_v0 = vld [vmem:[%s172_s15 + $0x20] sm:$0xff]  ;;  %v1072_v1 = vld [vmem:[%s172_s15 + $0x18] sm:$0xff]  ;;  %s922_s18 = smov 80   ;;  %s923_s23 = smov 81   ;;  %vm461_vm0 = vcmask 130048   ;;  %v195_v7 = vlaneseq }
  0x41   : > { %446 = vrot.lane.b32.xlu0 %v1070_v0, %s922_s18  ;;  %444 = vrot.lane.b32.xlu1 %v1072_v1, %s922_s18  ;;  %v231_v2 = vld [vmem:[%s172_s15 + $0x28] sm:$0xff]  ;;  %v228_v4 = vld [vmem:[%s172_s15 + $0x10] sm:$0xff]  ;;  %s924_s20 = smov 95   ;;  %s925_s26 = smov 96   ;;  %vm450_vm1 = vcmask 654336   ;;  %vm358_vm2 = vcmask 662528  }
  0x42   : > { %v227_v3 = vld [vmem:[%s172_s15 + $0x8] sm:$0xff]  ;;  %v226_v5 = vld [vmem:[%s172_s15] sm:$0xff]  ;;  %s926_s16 = smov 97   ;;  %s927_s19 = smov 111   ;;  %v196_v8 = vand.u32 127, %v195_v7  ;;  %vm333_vm5 = vcmask 777216  }
  0x43   : > { %s928_s24 = smov 112   ;;  %s929_s30 = smov 113   ;;  %v460_v6 = vld [vmem:[#allocation2 + $0x8] sm:$0xff]  ;;  %vm429_vm8 = vcmask 785408   ;;  %vm308_vm9 = vcmask 793600   ;;  %vm283_vm10 = vcmask 908288  }
  0x44   : > { %684 = vmatprep.mubr.msk.f32.mxu0 %vm461_vm0, %v460_v6  ;;  %s930_s25 = smov 79   ;;  %v197_v11 = vadd.s32 128, %v196_v8  ;;  %v202_v22 = vand.u32 15, %v196_v8  ;;  %vm408_vm11 = vcmask 916480   ;;  %vm254_vm12 = vcmask 924672   ;;  %s659_s3 = sshll.u32 %s1062_s29, 4 }
  0x45   : > { %448 = vrot.lane.b32.xlu0 %v231_v2, %s922_s18  ;;  %440 = vrot.lane.b32.xlu1 %v227_v3, %s922_s18  ;;  %vm383_vm13 = vcmask 646144   ;;  %s192_s4 = scalar_lea.vmem [#allocation7], %s659_s3  ;;  %s690_s5 = sshll.u32 %s908_s12, 8 }
  0x46   : > { %v209_v16 = vand.u32 15, %v197_v11  ;;  %vm1099_vm4 = vcmp.ne.s32.totalorder %v202_v22, 0  ;;  %vm1118_vm7 = vcmp.ne.s32.totalorder %v202_v22, 15  ;;  %s555_s6 = sshll.u32 %s192_s4, 4  ;;  %s553_s8 = scalar_lea.hbm %s1209_s2, %s690_s5  ;;  %s1162_s6 = int_to_ptr.vmem [resolvable:$true] %s555_s6 }
  0x47   : > { %s539_s15 = scalar_lea.sflag [#allocation4], %s1062_s29  ;;  %p1229_p13 = scmp.ne.s32.totalorder %s1215_s21, 0 }
  0x48   : > { %vm1092_vm3 = vcmp.ne.s32.totalorder %v209_v16, 0  ;;  %vm1112_vm6 = vcmp.ne.s32.totalorder %v209_v16, 15  ;;  %s931_s12 = smov [#allocation7]  }
  0x49   : > { %442 = vrot.lane.b32.xlu0 %v228_v4, %s922_s18  ;;  %438 = vrot.lane.b32.xlu1 %v226_v5, %s922_s18  ;;  %s832_s18 = scalar_lea.vmem %s1162_s6, 256 }
  0x4a   : > { %p833_p3 = scmp.ne.s32.totalorder %s1162_s6, %s832_s18 }
  0x4c   : > { %p834_p4 = pnand %p833_p3, %p1229_p13 }
  0x4d   : > { %354 = vrot.lane.b32.xlu0 %v1070_v0, %s923_s23  ;;  %356 = vrot.lane.b32.xlu1 %v231_v2, %s923_s23 }
  0x4e   : > { %p835_p1 = pneg %p834_p4 }
  0x51   : > { %352 = vrot.lane.b32.xlu0 %v1072_v1, %s923_s23  ;;  %348 = vrot.lane.b32.xlu1 %v227_v3, %s923_s23 }
  0x55   : > { %350 = vrot.lane.b32.xlu0 %v228_v4, %s923_s23  ;;  %346 = vrot.lane.b32.xlu1 %v226_v5, %s923_s23  ;;  %s836_s23 = sshll.u32 %s931_s12, 4  ;;  %s837_s23 = int_to_ptr.vmem [resolvable:$false] %s836_s23 }
  0x56   : > { %p839_p8 = scmp.lt.s32.totalorder %s1162_s6, %s837_s23 }
  0x59   : > { %329 = vrot.lane.b32.xlu0 %v1070_v0, %s924_s20  ;;  %331 = vrot.lane.b32.xlu1 %v231_v2, %s924_s20 }
  0x5d   : > { %327 = vrot.lane.b32.xlu0 %v1072_v1, %s924_s20  ;;  %323 = vrot.lane.b32.xlu1 %v227_v3, %s924_s20 }
  0x61   : > { %325 = vrot.lane.b32.xlu0 %v228_v4, %s924_s20  ;;  %321 = vrot.lane.b32.xlu1 %v226_v5, %s924_s20  ;;  %s838_s20 = scalar_lea.vmem %s837_s23, 512 }
  0x62   : > { %p840_p7 = scmp.lt.s32.totalorder %s838_s20, %s832_s18 }
  0x64   : > { %p841_p9 = por %p840_p7, %p839_p8 }
  0x65   : > { %425 = vrot.lane.b32.xlu0 %v1070_v0, %s925_s26  ;;  %427 = vrot.lane.b32.xlu1 %v231_v2, %s925_s26 }
  0x66   : > { %p842_p12 = pnand %p841_p9, %p835_p1 }
  0x69   : > { %423 = vrot.lane.b32.xlu0 %v1072_v1, %s925_s26  ;;  %419 = vrot.lane.b32.xlu1 %v227_v3, %s925_s26 }
  0x6d   : > { %421 = vrot.lane.b32.xlu0 %v228_v4, %s925_s26  ;;  %417 = vrot.lane.b32.xlu1 %v226_v5, %s925_s26 }
  0x71   : > { %304 = vrot.lane.b32.xlu0 %v1070_v0, %s926_s16  ;;  %306 = vrot.lane.b32.xlu1 %v231_v2, %s926_s16 }
  0x75   : > { %302 = vrot.lane.b32.xlu0 %v1072_v1, %s926_s16  ;;  %298 = vrot.lane.b32.xlu1 %v227_v3, %s926_s16 }
  0x79   : > { %300 = vrot.lane.b32.xlu0 %v228_v4, %s926_s16  ;;  %296 = vrot.lane.b32.xlu1 %v226_v5, %s926_s16 }
  0x7d   : > { %279 = vrot.lane.b32.xlu0 %v1070_v0, %s927_s19  ;;  %281 = vrot.lane.b32.xlu1 %v231_v2, %s927_s19 }
  0x81   : > { %277 = vrot.lane.b32.xlu0 %v1072_v1, %s927_s19  ;;  %273 = vrot.lane.b32.xlu1 %v227_v3, %s927_s19 }
  0x85   : > { %275 = vrot.lane.b32.xlu0 %v228_v4, %s927_s19  ;;  %271 = vrot.lane.b32.xlu1 %v226_v5, %s927_s19 }
  0x89   : > { %404 = vrot.lane.b32.xlu0 %v1070_v0, %s928_s24  ;;  %406 = vrot.lane.b32.xlu1 %v231_v2, %s928_s24 }
  0x8d   : > { %402 = vrot.lane.b32.xlu0 %v1072_v1, %s928_s24  ;;  %398 = vrot.lane.b32.xlu1 %v227_v3, %s928_s24 }
  0x91   : > { %400 = vrot.lane.b32.xlu0 %v228_v4, %s928_s24  ;;  %396 = vrot.lane.b32.xlu1 %v226_v5, %s928_s24 }
  0x95   : > { %250 = vrot.lane.b32.xlu0 %v1070_v0, %s929_s30  ;;  %252 = vrot.lane.b32.xlu1 %v231_v2, %s929_s30 }
  0x99   : > { %248 = vrot.lane.b32.xlu0 %v1072_v1, %s929_s30  ;;  %244 = vrot.lane.b32.xlu1 %v227_v3, %s929_s30 }
  0x9d   : > { %246 = vrot.lane.b32.xlu0 %v228_v4, %s929_s30  ;;  %242 = vrot.lane.b32.xlu1 %v226_v5, %s929_s30 }
  0xa1   : > { %379 = vrot.lane.b32.xlu0 %v1070_v0, %s930_s25  ;;  %381 = vrot.lane.b32.xlu1 %v231_v2, %s930_s25 }
  0xa5   : > { %377 = vrot.lane.b32.xlu0 %v1072_v1, %s930_s25  ;;  %373 = vrot.lane.b32.xlu1 %v227_v3, %s930_s25 }
  0xa9   : > { %375 = vrot.lane.b32.xlu0 %v228_v4, %s930_s25  ;;  %371 = vrot.lane.b32.xlu1 %v226_v5, %s930_s25 }
  0xb3   : > { %v447_v9 = vpop.permute.xlu0 %446  ;;  %v445_v10 = vpop.permute.xlu1 %444 }
  0xb4   : > { %v453_v15 = vsel %vm450_vm1, %v445_v10, %v447_v9 }
  0xb7   : > { %v449_v12 = vpop.permute.xlu0 %448  ;;  %v441_v13 = vpop.permute.xlu1 %440 }
  0xb8   : > { %v454_v14 = vsel %vm450_vm1, %v447_v9, %v449_v12 }
  0xb9   : > { %465 = vmatprep.subr.mxu0 %v454_v14 }
  0xba   : > { %466 = vmatpush1.msra.mxu0 %v453_v15 }
  0xbb   : > { %v443_v17 = vpop.permute.xlu0 %442  ;;  %v439_v18 = vpop.permute.xlu1 %438 }
  0xbc   : > { %v452_v19 = vsel %vm450_vm1, %v441_v13, %v443_v17  ;;  %v451_v20 = vsel %vm450_vm1, %v439_v18, %v441_v13 }
  0xbd   : > { %467 = vmatprep.subr.mxu0 %v452_v19 }
  0xbe   : > { %468 = vmatpush1.msra.mxu0 %v451_v20 }
  0xbf   : > { %v355_v23 = vpop.permute.xlu0 %354  ;;  %v357_v24 = vpop.permute.xlu1 %356 }
  0xc0   : > { %v362_v25 = vsel %vm358_vm2, %v355_v23, %v357_v24 }
  0xc1   : > { %660 = vmatprep.subr.msk.mxu0 %vm1092_vm3, %v362_v25 }
  0xc3   : > { %v353_v27 = vpop.permute.xlu0 %352  ;;  %v349_v28 = vpop.permute.xlu1 %348 }
  0xc4   : > { %v361_v29 = vsel %vm358_vm2, %v353_v27, %v355_v23 }
  0xc5   : > { %661 = vmatpush1.msk.msra.mxu0 %vm1099_vm4, %v361_v29 }
  0xc7   : > { %v351_v30 = vpop.permute.xlu0 %350  ;;  %v347_v31 = vpop.permute.xlu1 %346 }
  0xc8   : > { %v360_v32 = vsel %vm358_vm2, %v349_v28, %v351_v30  ;;  %v359_v33 = vsel %vm358_vm2, %v347_v31, %v349_v28 }
  0xc9   : > { %662 = vmatprep.subr.msk.mxu0 %vm1092_vm3, %v360_v32 }
  0xca   : > { %663 = vmatpush1.msk.msra.mxu0 %vm1099_vm4, %v359_v33 }
  0xcb   : > { %v330_v35 = vpop.permute.xlu0 %329  ;;  %v332_v36 = vpop.permute.xlu1 %331 }
  0xcc   : > { %v337_v37 = vsel %vm333_vm5, %v330_v35, %v332_v36 }
  0xcd   : > { %664 = vmatprep.subr.msk.mxu0 %vm1112_vm6, %v337_v37 }
  0xcf   : > { %v328_v39 = vpop.permute.xlu0 %327  ;;  %v324_v40 = vpop.permute.xlu1 %323 }
  0xd0   : > { %v336_v41 = vsel %vm333_vm5, %v328_v39, %v330_v35 }
  0xd1   : > { %665 = vmatpush1.msk.msra.mxu0 %vm1118_vm7, %v336_v41 }
  0xd3   : > { %v326_v42 = vpop.permute.xlu0 %325  ;;  %v322_v43 = vpop.permute.xlu1 %321 }
  0xd4   : > { %v335_v44 = vsel %vm333_vm5, %v324_v40, %v326_v42  ;;  %v334_v45 = vsel %vm333_vm5, %v322_v43, %v324_v40 }
  0xd5   : > { %666 = vmatprep.subr.msk.mxu0 %vm1112_vm6, %v335_v44  ;;  %v459_v44 = vld [vmem:[#allocation2] sm:$0xff] }
  0xd6   : > { %667 = vmatpush1.msk.msra.mxu0 %vm1118_vm7, %v334_v45 }
  0xd7   : > { %v426_v46 = vpop.permute.xlu0 %425  ;;  %v428_v47 = vpop.permute.xlu1 %427 }
  0xd8   : > { %v433_v48 = vsel %vm429_vm8, %v426_v46, %v428_v47 }
  0xd9   : > { %477 = vmatprep.subr.mxu0 %v433_v48 }
  0xdb   : > { %v424_v49 = vpop.permute.xlu0 %423  ;;  %v420_v50 = vpop.permute.xlu1 %419 }
  0xdc   : > { %v432_v51 = vsel %vm429_vm8, %v424_v49, %v426_v46 }
  0xdd   : > { %478 = vmatpush1.msra.mxu0 %v432_v51 }
  0xdf   : > { %v422_v52 = vpop.permute.xlu0 %421  ;;  %v418_v53 = vpop.permute.xlu1 %417 }
  0xe0   : > { %v431_v54 = vsel %vm429_vm8, %v420_v50, %v422_v52  ;;  %v430_v55 = vsel %vm429_vm8, %v418_v53, %v420_v50 }
  0xe1   : > { %479 = vmatprep.subr.mxu0 %v431_v54 }
  0xe2   : > { %480 = vmatpush1.msra.mxu0 %v430_v55 }
  0xe3   : > { %v305_v56 = vpop.permute.xlu0 %304  ;;  %v307_v57 = vpop.permute.xlu1 %306 }
  0xe4   : > { %v312_v58 = vsel %vm308_vm9, %v305_v56, %v307_v57 }
  0xe5   : > { %668 = vmatprep.subr.msk.mxu0 %vm1092_vm3, %v312_v58 }
  0xe7   : > { %v303_v59 = vpop.permute.xlu0 %302  ;;  %v299_v60 = vpop.permute.xlu1 %298 }
  0xe8   : > { %v311_v61 = vsel %vm308_vm9, %v303_v59, %v305_v56 }
  0xe9   : > { %669 = vmatpush1.msk.msra.mxu0 %vm1099_vm4, %v311_v61 }
  0xeb   : > { %v301_v62 = vpop.permute.xlu0 %300  ;;  %v297_v63 = vpop.permute.xlu1 %296 }
  0xec   : > { %v310_v0 = vsel %vm308_vm9, %v299_v60, %v301_v62  ;;  %v309_v1 = vsel %vm308_vm9, %v297_v63, %v299_v60 }
  0xed   : > { %670 = vmatprep.subr.msk.mxu0 %vm1092_vm3, %v310_v0 }
  0xee   : > { %671 = vmatpush1.msk.msra.mxu0 %vm1099_vm4, %v309_v1 }
  0xef   : > { %v280_v2 = vpop.permute.xlu0 %279  ;;  %v282_v3 = vpop.permute.xlu1 %281 }
  0xf0   : > { %v287_v4 = vsel %vm283_vm10, %v280_v2, %v282_v3 }
  0xf1   : > { %672 = vmatprep.subr.msk.mxu0 %vm1112_vm6, %v287_v4 }
  0xf3   : > { %v278_v5 = vpop.permute.xlu0 %277  ;;  %v274_v6 = vpop.permute.xlu1 %273 }
  0xf4   : > { %v286_v7 = vsel %vm283_vm10, %v278_v5, %v280_v2 }
  0xf5   : > { %673 = vmatpush1.msk.msra.mxu0 %vm1118_vm7, %v286_v7 }
  0xf7   : > { %v276_v8 = vpop.permute.xlu0 %275  ;;  %v272_v9 = vpop.permute.xlu1 %271 }
  0xf8   : > { %v285_v10 = vsel %vm283_vm10, %v274_v6, %v276_v8  ;;  %v284_v11 = vsel %vm283_vm10, %v272_v9, %v274_v6 }
  0xf9   : > { %674 = vmatprep.subr.msk.mxu0 %vm1112_vm6, %v285_v10 }
  0xfa   : > { %675 = vmatpush1.msk.msra.mxu0 %vm1118_vm7, %v284_v11 }
  0xfb   : > { %v405_v12 = vpop.permute.xlu0 %404  ;;  %v407_v13 = vpop.permute.xlu1 %406 }
  0xfc   : > { %v412_v14 = vsel %vm408_vm11, %v405_v12, %v407_v13 }
  0xfd   : > { %489 = vmatprep.subr.mxu0 %v412_v14 }
  0xff   : > { %v403_v15 = vpop.permute.xlu0 %402  ;;  %v399_v16 = vpop.permute.xlu1 %398 }
 0x100   : > { %v411_v17 = vsel %vm408_vm11, %v403_v15, %v405_v12 }
 0x101   : > { %490 = vmatpush1.msra.mxu0 %v411_v17 }
 0x103   : > { %v401_v18 = vpop.permute.xlu0 %400  ;;  %v397_v19 = vpop.permute.xlu1 %396 }
 0x104   : > { %v410_v20 = vsel %vm408_vm11, %v399_v16, %v401_v18  ;;  %v409_v22 = vsel %vm408_vm11, %v397_v19, %v399_v16 }
 0x105   : > { %491 = vmatprep.subr.mxu0 %v410_v20 }
 0x106   : > { %492 = vmatpush1.msra.mxu0 %v409_v22 }
 0x107   : > { %v251_v23 = vpop.permute.xlu0 %250  ;;  %v253_v24 = vpop.permute.xlu1 %252 }
 0x108   : > { %v258_v25 = vsel %vm254_vm12, %v251_v23, %v253_v24 }
 0x109   : > { %676 = vmatprep.subr.msk.mxu0 %vm1092_vm3, %v258_v25 }
 0x10b   : > { %v249_v27 = vpop.permute.xlu0 %248  ;;  %v245_v28 = vpop.permute.xlu1 %244 }
 0x10c   : > { %v257_v29 = vsel %vm254_vm12, %v249_v27, %v251_v23 }
 0x10d   : > { %677 = vmatpush1.msk.msra.mxu0 %vm1099_vm4, %v257_v29 }
 0x10f   : > { %v247_v30 = vpop.permute.xlu0 %246  ;;  %v243_v31 = vpop.permute.xlu1 %242 }
 0x110   : > { %v256_v32 = vsel %vm254_vm12, %v245_v28, %v247_v30  ;;  %v255_v33 = vsel %vm254_vm12, %v243_v31, %v245_v28 }
 0x111   : > { %678 = vmatprep.subr.msk.mxu0 %vm1092_vm3, %v256_v32 }
 0x112   : > { %679 = vmatpush1.msk.msra.mxu0 %vm1099_vm4, %v255_v33 }
 0x113   : > { %v380_v35 = vpop.permute.xlu0 %379  ;;  %v382_v36 = vpop.permute.xlu1 %381 }
 0x114   : > { %v387_v37 = vsel %vm383_vm13, %v380_v35, %v382_v36 }
 0x115   : > { %680 = vmatprep.subr.msk.mxu0 %vm1112_vm6, %v387_v37 }
 0x117   : > { %v378_v39 = vpop.permute.xlu0 %377  ;;  %v374_v40 = vpop.permute.xlu1 %373 }
 0x118   : > { %v386_v41 = vsel %vm383_vm13, %v378_v39, %v380_v35 }
 0x119   : > { %681 = vmatpush2.msk.msra.mxu0 %vm1118_vm7, %v386_v41 }
 0x11b   : > { %v376_v21 = vpop.permute.xlu0 %375  ;;  %v372_v42 = vpop.permute.xlu1 %371 }
 0x11c   : > { %v385_v43 = vsel %vm383_vm13, %v374_v40, %v376_v21  ;;  %v384_v26 = vsel %vm383_vm13, %v372_v42, %v374_v40 }
 0x11d   : > { %682 = vmatprep.subr.msk.mxu0 %vm1112_vm6, %v385_v43 }
 0x11e   : > { %683 = vmatpush2.msk.msra.mxu0 %vm1118_vm7, %v384_v26 }
 0x11f   : > { %530 = vmatmul.mubr.f32.vlgmr.msra.gmra.mxu0 %v459_v44 }
 0x1df   : > { %v531_v45 = vpop.f32.mrf.mxu0 }
 0x1e0   : > { %536 = vst [vmem:[%s192_s4] sm:$0xff] %v531_v45 }
 0x1e1   : > { %v533_v34 = vpop.f32.mrf.mxu0 }
 0x1e2   : > { %537 = vst [vmem:[%s192_s4 + $0x8] sm:$0xff] %v533_v34 }
 0x1e3   : > { %845 = shalt.err (!%p842_p12)
}
 0x1e4   : > { %s846_s26 = scalar_lea.hbm %s553_s8, 256  ;;  %s850_s19 = scalar_lea.hbm %s1209_s2, 512 }
 0x1e5   : > { %p847_p0 = scmp.ne.s32.totalorder %s553_s8, %s846_s26  ;;  %p851_p10 = scmp.lt.s32.totalorder %s553_s8, %s1209_s2 }
 0x1e6   : > { %p852_p11 = scmp.lt.s32.totalorder %s850_s19, %s846_s26 }
 0x1e7   : > { %p848_p2 = pnand %p847_p0, %p1229_p13 }
 0x1e8   : > { %p853_p5 = por %p852_p11, %p851_p10 }
 0x1e9   : > { %p849_p6 = pneg %p848_p2 }
 0x1eb   : > { %p854_p3 = pnand %p853_p5, %p849_p6 }
 0x1ed   : > { %857 = shalt.err (!%p854_p3)
}
 0x1ee   : > { %700 = dma.vmem_to_hbm [thread:$0]  (%p1229_p13), %s1162_s6, 256, %s553_s8, %s539_s15  }
 0x1ef PF: > { %s567_s25 = sand.u32 1, %s896_s9   ;;  %p1230_p4 = scmp.ne.s32.totalorder %s1216_s22, 0 }
 0x1f0   : > { %p1231_p1 = scmp.ge.s32.totalorder %s916_s14, 2  ;;  %s568_s3 = scalar_lea.sflag [#allocation4], %s567_s25 }
 0x1f2   : > { %p711_p8 = pnand %p1231_p1, %p1230_p4 }
 0x1f4   : > { %p712_p7 = pneg %p711_p8 }
 0x1f6   : > { %891 = dma.done.wait (%p712_p7), %s568_s3, 256  }
 0x1f7   : > { %893 = vsyncadd (%p712_p7), %s568_s3, 4294967040  ;;  %s19_s14 = sadd.s32 1, %s916_s14   ;;  %s1232_s9 = smov %s900_s10 }
 0x1f8   : > { %p16_p9 = scmp.ge.s32.totalorder %s19_s14, 4   ;;  %s1233_s10 = smov %s904_s11 }
 0x1f9   : > { %s1234_s11 = smov %s1049_s27  ;;  %s1235_s12 = smov %s912_s13 }
 0x1fa   : > { %s1236_s13 = smov %s1238_s28  ;;  %18 = sbr.rel (!%p16_p9) target bundleno = 7 (0x7), region = 78 }
 0x1ff   :  { %573 = vsyncpa [#allocation3], 1 }
 0x200   :  { %575 = vsyncpa [#allocation3 + $0x1], 1 }
 0x201   :  { %576 = vsyncpa [#allocation6], 1 }
 0x202   :  { %578 = vsyncpa [#allocation6 + $0x1], 1 }
 0x203   :  { %579 = vsyncpa [#allocation4], 1 }
 0x204   :  { %581 = vsyncpa [#allocation4 + $0x1], 1 }

</bundles_post_ra>
